<compile_context>
chip_gen: v7x
topology: tpu7x:2x2x1
jax: 0.10.0
libtpu: 0.0.40
codegen_flags: <defaults>
</compile_context>

<pallas_src>
import jax
import jax.numpy as jnp
from jax import lax
from jax.experimental import pallas as pl
from jax.experimental.pallas import tpu as pltpu


H_ELECTRODES = 22   # conv2 spatial kernel height
K_TEMPORAL = 25     # conv1 temporal kernel width
POOL_K = 75         # avg-pool window
POOL_S = 15         # avg-pool stride  (POOL_K == 5 * POOL_S)


# -----------------------------------------------------------------------------
# Pallas kernel: whole PatchEmbedding forward for a block of BB batch elements.
# -----------------------------------------------------------------------------
def patch_embed_kernel(patches_ref,   # (BB, W1, H*K)  lane-dense fused im2col
                       w12_ref,       # (H*K, C)       conv1∘conv2 fused weight (BN scale folded)
                       shift_ref,     # (1, C)         fused conv biases + BN shift
                       w3_ref,        # (C, E)         1x1 projection weight (1/75 folded)
                       b3_ref,        # (1, E)
                       out_ref):      # (1, BB*Wp, E)
    BB, W1, HK = patches_ref.shape
    Wp = out_ref.shape[1] // BB
    nwin = POOL_K // POOL_S            # 5 stride-blocks per pooling window
    nparts = Wp + nwin - 1             # 15-row partial sums needed per batch element

    # ---- fused Conv2d(1,40,(1,25)) ∘ Conv2d(40,40,(22,1)): ONE matmul, K = 550 -------
    p = patches_ref[...].reshape(BB * W1, HK)
    z = jnp.dot(p, w12_ref[...], preferred_element_type=jnp.float32)     # (BB*W1, C)

    # ---- biases + BatchNorm2d(eval) folded into one shift; then ELU -------------------
    z = z + shift_ref[...]
    # exp(z)-1 (not expm1) kept deliberately: guaranteed Mosaic lowering, matches ref.
    z = jnp.where(z > 0, z, jnp.exp(z) - 1.0)

    # ---- AvgPool2d((1,75),(1,15)) on VPU/XLU: 15-row partial sums + window adds -------
    def part(b, j):                    # sum of 15 consecutive rows of batch element b
        r0 = b * W1 + j * POOL_S
        return jnp.sum(z[r0:r0 + POOL_S, :], axis=0, keepdims=True)

    s = jnp.concatenate([part(b, j) for b in range(BB) for j in range(nparts)],
                        axis=0)                                           # (BB*nparts, C)

    def shifted(i):                    # rows ordered (b, p) -> s[b, p + i]
        return jnp.concatenate(
            [s[b * nparts + i: b * nparts + i + Wp, :] for b in range(BB)], axis=0)

    pooled = shifted(0)
    for i in range(1, nwin):
        pooled = pooled + shifted(i)   # (BB*Wp, C); the 1/75 factor lives in w3_ref

    # ---- Conv2d(40, emb, (1,1)) projection + Rearrange('b e h w -> b (h w) e') --------
    out = jnp.dot(pooled, w3_ref[...], preferred_element_type=jnp.float32) + b3_ref[...]
    out_ref[0] = out.astype(out_ref.dtype)


# -----------------------------------------------------------------------------
# Wrapper: JAX-side glue (weight fusion, lane-dense im2col) + pallas_call
# -----------------------------------------------------------------------------
def patch_embedding_forward(x, params, *, matmul_dtype=jnp.float32):
    """x: (B, 1, 22, W) NCHW like the PyTorch module.  Returns (B, Wp, emb_size)."""
    B, Cin, H, W = x.shape
    assert Cin == 1 and H == H_ELECTRODES
    K = K_TEMPORAL
    W1 = W - K + 1
    Wp = (W1 - POOL_K) // POOL_S + 1
    C = params["w1"].shape[0]          # 40
    E = params["w3"].shape[0]          # emb_size
    HK = H * K                         # 550

    # Two parallel grid steps when B is even (keeps both v7x TensorCores busy);
    # otherwise one step folding the whole batch (lowest overhead on v5e/v6e).
    nblk = 2 if (B >= 2 and B % 2 == 0) else 1
    BB = B // nblk

    # ---- glue: lane-dense fused im2col, patches[b, w, k*H + h] = x[b, 0, h, w + k] ----
    x0 = x[:, 0]                                                        # (B, H, W)
    taps = jnp.stack([x0[:, :, k:k + W1] for k in range(K)], axis=1)    # (B, K, H, W1)
    patches = jnp.transpose(taps, (0, 3, 1, 2)).reshape(B, W1, HK)
    patches = patches.astype(matmul_dtype)

    # ---- glue: fold conv1 into conv2, then fold BatchNorm(eval) scale/shift -----------
    w1m = params["w1"][:, 0, 0, :]                  # (C, K)     [cin, k]
    w2m = params["w2"][:, :, :, 0]                  # (C, C, H)  [cout, cin, h]
    w12 = jnp.einsum("ik,oih->kho", w1m, w2m).reshape(HK, C)            # [k*H+h, cout]
    bias12 = jnp.einsum("i,oih->o", params["b1"], w2m) + params["b2"]

    eps = 1e-5
    bn_scale = params["bn_gamma"] / jnp.sqrt(params["bn_var"] + eps)
    bn_shift = params["bn_beta"] - params["bn_mean"] * bn_scale
    w12s = (w12 * bn_scale[None, :]).astype(matmul_dtype)               # (HK, C)
    shift = (bias12 * bn_scale + bn_shift).reshape(1, C).astype(jnp.float32)

    # ---- glue: projection weight with the 1/75 average-pool factor folded in ----------
    w3 = (params["w3"][:, :, 0, 0].T / float(POOL_K)).astype(jnp.float32)   # (C, E)
    b3 = params["b3"].reshape(1, E).astype(jnp.float32)

    out = pl.pallas_call(
        patch_embed_kernel,
        out_shape=jax.ShapeDtypeStruct((nblk, BB * Wp, E), jnp.float32),
        grid_spec=pltpu.PrefetchScalarGridSpec(
            num_scalar_prefetch=0,
            grid=(nblk,),
            in_specs=[
                pl.BlockSpec((BB, W1, HK), lambda i: (i, 0, 0)),
                pl.BlockSpec((HK, C), lambda i: (0, 0)),
                pl.BlockSpec((1, C), lambda i: (0, 0)),
                pl.BlockSpec((C, E), lambda i: (0, 0)),
                pl.BlockSpec((1, E), lambda i: (0, 0)),
            ],
            out_specs=pl.BlockSpec((1, BB * Wp, E), lambda i: (i, 0, 0)),
        ),
        compiler_params=pltpu.CompilerParams(
            dimension_semantics=("parallel",)),
    )(patches, w12s, shift, w3, b3)

    # rows within each block are (local batch, pool index) -> collapse to (B, Wp, E)
    return out.reshape(B, Wp, E)


# -----------------------------------------------------------------------------
# Pure-JAX reference (independent path through lax.conv / reduce_window)
# -----------------------------------------------------------------------------
def patch_embedding_reference(x, p):
    dn = ("NCHW", "OIHW", "NCHW")
    eps = 1e-5
    y = lax.conv_general_dilated(x, p["w1"], (1, 1), "VALID",
                                 dimension_numbers=dn) + p["b1"][None, :, None, None]
    y = lax.conv_general_dilated(y, p["w2"], (1, 1), "VALID",
                                 dimension_numbers=dn) + p["b2"][None, :, None, None]
    y = ((y - p["bn_mean"][None, :, None, None]) /
         jnp.sqrt(p["bn_var"] + eps)[None, :, None, None] *
         p["bn_gamma"][None, :, None, None] + p["bn_beta"][None, :, None, None])
    y = jnp.where(y > 0, y, jnp.exp(y) - 1.0)
    y = lax.reduce_window(y, 0.0, lax.add, (1, 1, 1, 75), (1, 1, 1, 15),
                          "VALID") / 75.0
    y = lax.conv_general_dilated(y, p["w3"], (1, 1), "VALID",
                                 dimension_numbers=dn) + p["b3"][None, :, None, None]
    B, E, Hh, Ww = y.shape
    return y.reshape(B, E, Hh * Ww).transpose(0, 2, 1)


if __name__ == "__main__":
    EMB = 40
    B, H, W = 2, 22, 144   # small temporal length (>= 99 so the avg-pool window fits)

    key = jax.random.PRNGKey(0)
    ks = jax.random.split(key, 8)
    params = {
        "w1": 0.1 * jax.random.normal(ks[0], (40, 1, 1, 25), jnp.float32),
        "b1": 0.1 * jax.random.normal(ks[1], (40,), jnp.float32),
        "w2": 0.05 * jax.random.normal(ks[2], (40, 40, 22, 1), jnp.float32),
        "b2": 0.1 * jax.random.normal(ks[3], (40,), jnp.float32),
        # BatchNorm2d defaults: gamma=1, beta=0, running_mean=0, running_var=1
        "bn_gamma": jnp.ones((40,), jnp.float32),
        "bn_beta": jnp.zeros((40,), jnp.float32),
        "bn_mean": jnp.zeros((40,), jnp.float32),
        "bn_var": jnp.ones((40,), jnp.float32),
        "w3": 0.1 * jax.random.normal(ks[4], (EMB, 40, 1, 1), jnp.float32),
        "b3": 0.1 * jax.random.normal(ks[5], (EMB,), jnp.float32),
    }
    x = jax.random.normal(ks[6], (B, 1, H, W), jnp.float32)

    out = jax.block_until_ready(patch_embedding_forward(x, params))
    ref = jax.block_until_ready(patch_embedding_reference(x, params))

    assert out.shape == ref.shape == (B, (W - 24 - 75) // 15 + 1, EMB), out.shape
    assert jnp.allclose(out, ref, rtol=1e-4, atol=1e-4), \
        float(jnp.max(jnp.abs(out - ref)))
    print("KERNEL_OK")
</pallas_src>

<mosaic_0001>
module attributes {stable_mosaic.version = 11 : i64} {
  func.func @patch_embed_kernel(%arg0: i32, %arg1: memref<1x120x550xf32, #tpu.memory_space<vmem>>, %arg2: memref<550x40xf32, #tpu.memory_space<vmem>>, %arg3: memref<1x40xf32, #tpu.memory_space<vmem>>, %arg4: memref<40x40xf32, #tpu.memory_space<vmem>>, %arg5: memref<1x40xf32, #tpu.memory_space<vmem>>, %arg6: memref<1x4x40xf32, #tpu.memory_space<vmem>>) attributes {dimension_semantics = [#tpu.dimension_semantics<parallel>], iteration_bounds = array<i64: 2>, scalar_prefetch = 0 : i64, scratch_operands = 0 : i64, tpu.core_type = #tpu.core_type<tc>, window_params = [{transform_indices = @transform_0, window_bounds = array<i64: 1, 120, 550>}, {pipeline_mode = #tpu.pipeline_mode<synchronous>, transform_indices = @transform_1, window_bounds = array<i64: 550, 40>}, {pipeline_mode = #tpu.pipeline_mode<synchronous>, transform_indices = @transform_2, window_bounds = array<i64: 1, 40>}, {pipeline_mode = #tpu.pipeline_mode<synchronous>, transform_indices = @transform_3, window_bounds = array<i64: 40, 40>}, {pipeline_mode = #tpu.pipeline_mode<synchronous>, transform_indices = @transform_4, window_bounds = array<i64: 1, 40>}, {transform_indices = @transform_5, window_bounds = array<i64: 1, 4, 40>}]} {
    %c0 = arith.constant 0 : index
    %c0_0 = arith.constant 0 : index
    %c0_1 = arith.constant 0 : index
    %0 = vector.load %arg1[%c0, %c0_0, %c0_1] : memref<1x120x550xf32, #tpu.memory_space<vmem>>, vector<1x120x550xf32>
    %1 = vector.shape_cast %0 : vector<1x120x550xf32> to vector<120x550xf32>
    %c0_2 = arith.constant 0 : index
    %c0_3 = arith.constant 0 : index
    %2 = vector.load %arg2[%c0_2, %c0_3] : memref<550x40xf32, #tpu.memory_space<vmem>>, vector<550x40xf32>
    %cst = arith.constant dense<0.000000e+00> : vector<120x40xf32>
    %3 = tpu.matmul %1, %2, %cst {dimension_numbers = #tpu.dot_dimension_numbers<[1], [0], [0], [1], [0, 0, 1, 1], [], []>} : vector<120x550xf32>, vector<550x40xf32>, vector<120x40xf32> -> vector<120x40xf32>
    %c0_4 = arith.constant 0 : index
    %c0_5 = arith.constant 0 : index
    %4 = vector.load %arg3[%c0_4, %c0_5] : memref<1x40xf32, #tpu.memory_space<vmem>>, vector<1x40xf32>
    %5 = vector.broadcast %4 : vector<1x40xf32> to vector<120x40xf32>
    %6 = arith.addf %3, %5 : vector<120x40xf32>
    %cst_6 = arith.constant 0.000000e+00 : f32
    %7 = vector.broadcast %cst_6 : f32 to vector<120x40xf32>
    %8 = arith.cmpf ogt, %6, %7 : vector<120x40xf32>
    %9 = math.exp %6 : vector<120x40xf32>
    %cst_7 = arith.constant 1.000000e+00 : f32
    %10 = vector.broadcast %cst_7 : f32 to vector<120x40xf32>
    %11 = arith.subf %9, %10 : vector<120x40xf32>
    %12 = arith.select %8, %6, %11 : vector<120x40xi1>, vector<120x40xf32>
    %13 = vector.extract_strided_slice %12 {offsets = [0, 0], sizes = [15, 40], strides = [1, 1]} : vector<120x40xf32> to vector<15x40xf32>
    %cst_8 = arith.constant dense<0.000000e+00> : vector<40xf32>
    %14 = vector.multi_reduction <add>, %13, %cst_8 [0] : vector<15x40xf32> to vector<40xf32>
    %15 = vector.shape_cast %14 : vector<40xf32> to vector<1x40xf32>
    %16 = vector.extract_strided_slice %12 {offsets = [15, 0], sizes = [15, 40], strides = [1, 1]} : vector<120x40xf32> to vector<15x40xf32>
    %cst_9 = arith.constant dense<0.000000e+00> : vector<40xf32>
    %17 = vector.multi_reduction <add>, %16, %cst_9 [0] : vector<15x40xf32> to vector<40xf32>
    %18 = vector.shape_cast %17 : vector<40xf32> to vector<1x40xf32>
    %19 = vector.extract_strided_slice %12 {offsets = [30, 0], sizes = [15, 40], strides = [1, 1]} : vector<120x40xf32> to vector<15x40xf32>
    %cst_10 = arith.constant dense<0.000000e+00> : vector<40xf32>
    %20 = vector.multi_reduction <add>, %19, %cst_10 [0] : vector<15x40xf32> to vector<40xf32>
    %21 = vector.shape_cast %20 : vector<40xf32> to vector<1x40xf32>
    %22 = vector.extract_strided_slice %12 {offsets = [45, 0], sizes = [15, 40], strides = [1, 1]} : vector<120x40xf32> to vector<15x40xf32>
    %cst_11 = arith.constant dense<0.000000e+00> : vector<40xf32>
    %23 = vector.multi_reduction <add>, %22, %cst_11 [0] : vector<15x40xf32> to vector<40xf32>
    %24 = vector.shape_cast %23 : vector<40xf32> to vector<1x40xf32>
    %25 = vector.extract_strided_slice %12 {offsets = [60, 0], sizes = [15, 40], strides = [1, 1]} : vector<120x40xf32> to vector<15x40xf32>
    %cst_12 = arith.constant dense<0.000000e+00> : vector<40xf32>
    %26 = vector.multi_reduction <add>, %25, %cst_12 [0] : vector<15x40xf32> to vector<40xf32>
    %27 = vector.shape_cast %26 : vector<40xf32> to vector<1x40xf32>
    %28 = vector.extract_strided_slice %12 {offsets = [75, 0], sizes = [15, 40], strides = [1, 1]} : vector<120x40xf32> to vector<15x40xf32>
    %cst_13 = arith.constant dense<0.000000e+00> : vector<40xf32>
    %29 = vector.multi_reduction <add>, %28, %cst_13 [0] : vector<15x40xf32> to vector<40xf32>
    %30 = vector.shape_cast %29 : vector<40xf32> to vector<1x40xf32>
    %31 = vector.extract_strided_slice %12 {offsets = [90, 0], sizes = [15, 40], strides = [1, 1]} : vector<120x40xf32> to vector<15x40xf32>
    %cst_14 = arith.constant dense<0.000000e+00> : vector<40xf32>
    %32 = vector.multi_reduction <add>, %31, %cst_14 [0] : vector<15x40xf32> to vector<40xf32>
    %33 = vector.shape_cast %32 : vector<40xf32> to vector<1x40xf32>
    %34 = vector.extract_strided_slice %12 {offsets = [105, 0], sizes = [15, 40], strides = [1, 1]} : vector<120x40xf32> to vector<15x40xf32>
    %cst_15 = arith.constant dense<0.000000e+00> : vector<40xf32>
    %35 = vector.multi_reduction <add>, %34, %cst_15 [0] : vector<15x40xf32> to vector<40xf32>
    %36 = vector.shape_cast %35 : vector<40xf32> to vector<1x40xf32>
    %37 = tpu.concatenate %15, %18, %21, %24, %27, %30, %33, %36 in 0 : vector<1x40xf32>, vector<1x40xf32>, vector<1x40xf32>, vector<1x40xf32>, vector<1x40xf32>, vector<1x40xf32>, vector<1x40xf32>, vector<1x40xf32> -> vector<8x40xf32>
    %38 = vector.extract_strided_slice %37 {offsets = [0, 0], sizes = [4, 40], strides = [1, 1]} : vector<8x40xf32> to vector<4x40xf32>
    %39 = vector.extract_strided_slice %37 {offsets = [1, 0], sizes = [4, 40], strides = [1, 1]} : vector<8x40xf32> to vector<4x40xf32>
    %40 = arith.addf %38, %39 : vector<4x40xf32>
    %41 = vector.extract_strided_slice %37 {offsets = [2, 0], sizes = [4, 40], strides = [1, 1]} : vector<8x40xf32> to vector<4x40xf32>
    %42 = arith.addf %40, %41 : vector<4x40xf32>
    %43 = vector.extract_strided_slice %37 {offsets = [3, 0], sizes = [4, 40], strides = [1, 1]} : vector<8x40xf32> to vector<4x40xf32>
    %44 = arith.addf %42, %43 : vector<4x40xf32>
    %45 = vector.extract_strided_slice %37 {offsets = [4, 0], sizes = [4, 40], strides = [1, 1]} : vector<8x40xf32> to vector<4x40xf32>
    %46 = arith.addf %44, %45 : vector<4x40xf32>
    %c0_16 = arith.constant 0 : index
    %c0_17 = arith.constant 0 : index
    %47 = vector.load %arg4[%c0_16, %c0_17] : memref<40x40xf32, #tpu.memory_space<vmem>>, vector<40x40xf32>
    %cst_18 = arith.constant dense<0.000000e+00> : vector<4x40xf32>
    %48 = tpu.matmul %46, %47, %cst_18 {dimension_numbers = #tpu.dot_dimension_numbers<[1], [0], [0], [1], [0, 0, 1, 1], [], []>} : vector<4x40xf32>, vector<40x40xf32>, vector<4x40xf32> -> vector<4x40xf32>
    %c0_19 = arith.constant 0 : index
    %c0_20 = arith.constant 0 : index
    %49 = vector.load %arg5[%c0_19, %c0_20] : memref<1x40xf32, #tpu.memory_space<vmem>>, vector<1x40xf32>
    %50 = vector.broadcast %49 : vector<1x40xf32> to vector<4x40xf32>
    %51 = arith.addf %48, %50 : vector<4x40xf32>
    %c0_21 = arith.constant 0 : index
    %c0_22 = arith.constant 0 : index
    %c0_23 = arith.constant 0 : index
    %52 = vector.load %arg6[%c0_21, %c0_22, %c0_23] : memref<1x4x40xf32, #tpu.memory_space<vmem>>, vector<1x4x40xf32>
    %53 = vector.shape_cast %52 : vector<1x4x40xf32> to vector<4x40xf32>
    %54 = vector.shape_cast %51 : vector<4x40xf32> to vector<1x4x40xf32>
    tpu.vector_store %arg6[%c0_21, %c0_22, %c0_23], %54 {strides = array<i32>} : memref<1x4x40xf32, #tpu.memory_space<vmem>>, vector<1x4x40xf32>,
    return
  }
  func.func @transform_0(%arg0: i32) -> (i32, i32, i32) {
    %c0_i32 = arith.constant 0 : i32
    %c0_i32_0 = arith.constant 0 : i32
    %c0_i32_1 = arith.constant 0 : i32
    return %arg0, %c0_i32, %c0_i32_0 : i32, i32, i32
  }
  func.func @transform_1(%arg0: i32) -> (i32, i32) {
    %c0_i32 = arith.constant 0 : i32
    %c0_i32_0 = arith.constant 0 : i32
    %c0_i32_1 = arith.constant 0 : i32
    return %c0_i32, %c0_i32_0 : i32, i32
  }
  func.func @transform_2(%arg0: i32) -> (i32, i32) {
    %c0_i32 = arith.constant 0 : i32
    %c0_i32_0 = arith.constant 0 : i32
    %c0_i32_1 = arith.constant 0 : i32
    return %c0_i32, %c0_i32_0 : i32, i32
  }
  func.func @transform_3(%arg0: i32) -> (i32, i32) {
    %c0_i32 = arith.constant 0 : i32
    %c0_i32_0 = arith.constant 0 : i32
    %c0_i32_1 = arith.constant 0 : i32
    return %c0_i32, %c0_i32_0 : i32, i32
  }
  func.func @transform_4(%arg0: i32) -> (i32, i32) {
    %c0_i32 = arith.constant 0 : i32
    %c0_i32_0 = arith.constant 0 : i32
    %c0_i32_1 = arith.constant 0 : i32
    return %c0_i32, %c0_i32_0 : i32, i32
  }
  func.func @transform_5(%arg0: i32) -> (i32, i32, i32) {
    %c0_i32 = arith.constant 0 : i32
    %c0_i32_0 = arith.constant 0 : i32
    %c0_i32_1 = arith.constant 0 : i32
    return %arg0, %c0_i32, %c0_i32_0 : i32, i32, i32
  }
}

</mosaic_0001>

<bundles_post_ra>
// kernel: tpu_custom_call.1
= control target key start
LH: loop header
LB: loop body
LE: loop exit
PB: predicated region body
PF: predicated region fallthrough
CT: control target
= control target key end

     0   :  { %10 = vsyncpa [#allocation3], 0  ;;  %s2429_s0 = inlined_call_operand.vmem [shape: f32[2,120,550], index: 0, kind: input, shape index: {}]   ;;  %s2430_s1 = inlined_call_operand.vmem [shape: f32[550,40], index: 1, kind: input, shape index: {}]   ;;  %s2431_s2 = inlined_call_operand.vmem [shape: f32[1,40], index: 2, kind: input, shape index: {}]   ;;  %s2432_s3 = inlined_call_operand.vmem [shape: f32[40,40], index: 3, kind: input, shape index: {}]   ;;  %s2433_s4 = inlined_call_operand.vmem [shape: f32[1,40], index: 4, kind: input, shape index: {}]   ;;  %s2434_s5 = inlined_call_operand.hbm [shape: f32[2,4,40], index: 5, kind: output, shape index: {}]  }
   0x1   :  { %12 = vsyncpa [#allocation3 + $0x1], 0  ;;  %s1785_s18 = smov 0   ;;  %s1787_s19 = smov 0  }
   0x2   :  { %s1789_s20 = smov 0   ;;  %s1791_s21 = smov 0  }
   0x3 LB: > { %s1806_s22 = sadd.s32 4294967295, %s1749_s21   ;;  %s1240_s23 = sadd.s32 4294967294, %s1749_s21   ;;  %s1749_s21 = sphi %s1791_s21, %s2440_s21   ;;  %s1745_s20 = sphi %s1789_s20, %s2439_s20   ;;  %s1741_s19 = sphi %s1787_s19, %s2438_s19   ;;  %s1737_s18 = sphi %s1785_s18, %s2437_s18  }
   0x4   : > { %s1810_s24 = sadd.s32 1, %s1749_s21   ;;  %s135_s25 = sadd.s32 1, %s1745_s20 }
   0x5   : > { %s132_s26 = ssub.s32 %s1749_s21, %s1810_s24  ;;  %p145_p0 = scmp.ne.s32.totalorder %s1745_s20, %s1741_s19 }
   0x6   : > { %p133_p1 = scmp.eq.s32.totalorder %s132_s26, 0  ;;  %p146_p2 = scmp.eq.s32.totalorder %s1806_s22, 1 }
   0x7   : > { %p151_p3 = scmp.ne.s32.totalorder %s1741_s19, %s1737_s18  ;;  %p152_p4 = scmp.eq.s32.totalorder %s1240_s23, 1 }
   0x8   : > { %s1821_s27 = scalar_select %p133_p1, %s1745_s20, %s135_s25  }
   0x9   : > { %p1823_p5 = por %p146_p2, %p145_p0  ;;  %p1827_p6 = por %p152_p4, %p151_p3 }
   0xa   : > { %p1243_p7 = scmp.ge.s32.totalorder %s1749_s21, 1  ;;  %p190_p8 = scmp.lt.s32.totalorder %s1749_s21, 3 }
   0xc   : > { %p191_p9 = pnand %p1243_p7, %p190_p8 }
   0xd   : > { %v314_v0 = vld [vmem:[%s2430_s1 + $0x80] sm:$0xff] (!%p191_p9)  ;;  %v315_v1 = vld [vmem:[%s2430_s1 + $0x88] sm:$0xff] (!%p191_p9)  ;;  %v316_v11 = vld [vmem:[%s2430_s1 + $0x90] sm:$0xff] (!%p191_p9)  ;;  %p218_p10 = scmp.lt.s32.totalorder (!%p191_p9), %s1806_s22, 1  ;;  %vm420_vm0 = vcmask (!%p191_p9), 1045504   ;;  %vm1753_vm1 = vmmov (!%p191_p9), 0  }
   0xe   : > { %194 = sbr.rel (%p191_p9) target bundleno = 633 (0x279), region = 40  ;;  %v346_v2 = vld [vmem:[%s2430_s1 + $0x180] sm:$0xff] (!%p191_p9)  ;;  %v1532_v3 = vpack.c.bf16 (!%p191_p9), %v315_v1, %v314_v0  ;;  %v347_v4 = vld [vmem:[%s2430_s1 + $0x188] sm:$0xff] (!%p191_p9)  ;;  %v317_v13 = vld [vmem:[%s2430_s1 + $0x98] sm:$0xff] (!%p191_p9)  ;;  %vm374_vm2 = vcmask (!%p191_p9), 310272   ;;  %vm919_vm3 = vcmask (!%p191_p9), 326656  }
   0xf   : > { %v298_v5 = vld [vmem:[%s2430_s1] sm:$0xff] (!%p191_p9)  ;;  %v299_v6 = vld [vmem:[%s2430_s1 + $0x8] sm:$0xff] (!%p191_p9)  ;;  %v1564_v7 = vpack.c.bf16 (!%p191_p9), %v347_v4, %v346_v2  ;;  %v348_v14 = vld [vmem:[%s2430_s1 + $0x190] sm:$0xff] (!%p191_p9)  ;;  %v1536_v16 = vpack.c.bf16 (!%p191_p9), %v317_v13, %v316_v11  ;;  %vm921_vm4 = vcmask (!%p191_p9), 325632   ;;  %vm990_vm5 = vcmask (!%p191_p9), 1043456   ;;  %s215_s25 = sand.u32 (!%p191_p9), 1, %s1741_s19  }
  0x10   : > { %v1534_v8 = vpack.c.bf16 (!%p191_p9), %v299_v6, %v298_v5  ;;  %v330_v9 = vld [vmem:[%s2430_s1 + $0x100] sm:$0xff] (!%p191_p9)  ;;  %v331_v10 = vld [vmem:[%s2430_s1 + $0x108] sm:$0xff] (!%p191_p9)  ;;  %1533 = vmatprep.subr.bf16.mxu0 (!%p191_p9), %v1532_v3  ;;  %v349_v15 = vld [vmem:[%s2430_s1 + $0x198] sm:$0xff] (!%p191_p9)  ;;  %vm933_vm6 = vcmask (!%p191_p9), 1040384   ;;  %vm1009_vm10 = vcmask (!%p191_p9), 1044480   ;;  %vm952_vm14 = vcmask (!%p191_p9), 1041408  }
  0x11   : > { %v1566_v12 = vpack.c.bf16 (!%p191_p9), %v331_v10, %v330_v9  ;;  %1565 = vmatprep.subr.bf16.mxu1 (!%p191_p9), %v1564_v7  ;;  %v1568_v17 = vpack.c.bf16 (!%p191_p9), %v349_v15, %v348_v14  ;;  %v300_v18 = vld [vmem:[%s2430_s1 + $0x10] sm:$0xff] (!%p191_p9)  ;;  %v301_v19 = vld [vmem:[%s2430_s1 + $0x18] sm:$0xff] (!%p191_p9)  ;;  %v318_v23 = vld [vmem:[%s2430_s1 + $0xa0] sm:$0xff] (!%p191_p9)  ;;  %s1244_s26 = sshll.u32 (!%p191_p9), %s215_s25, 2  ;;  %s1168_s13 = scalar_lea.sflag (!%p191_p9), [#allocation3], %s215_s25 }
  0x12   : > { %1535 = vmatpush3.bf16.msra.mxu0 (!%p191_p9), %v1534_v8  ;;  %v332_v20 = vld [vmem:[%s2430_s1 + $0x110] sm:$0xff] (!%p191_p9)  ;;  %v1538_v21 = vpack.c.bf16 (!%p191_p9), %v301_v19, %v300_v18  ;;  %v333_v22 = vld [vmem:[%s2430_s1 + $0x118] sm:$0xff] (!%p191_p9)  ;;  %v319_v24 = vld [vmem:[%s2430_s1 + $0xa8] sm:$0xff] (!%p191_p9)  ;;  %s217_s8 = scalar_lea.vmem (!%p191_p9), [#allocation2], %s1244_s26 }
  0x13   : > { %1567 = vmatpush3.bf16.msra.mxu1 (!%p191_p9), %v1566_v12  ;;  %1537 = vmatprep.subr.bf16.mxu0 (!%p191_p9), %v1536_v16  ;;  %v1570_v25 = vpack.c.bf16 (!%p191_p9), %v333_v22, %v332_v20  ;;  %v1540_v26 = vpack.c.bf16 (!%p191_p9), %v319_v24, %v318_v23  ;;  %v350_v27 = vld [vmem:[%s2430_s1 + $0x1a0] sm:$0xff] (!%p191_p9)  ;;  %v351_v28 = vld [vmem:[%s2430_s1 + $0x1a8] sm:$0xff] (!%p191_p9)  ;;  %v320_v35 = vld [vmem:[%s2430_s1 + $0xb0] sm:$0xff] (!%p191_p9) }
  0x14   : > { %1569 = vmatprep.subr.bf16.mxu1 (!%p191_p9), %v1568_v17  ;;  %v302_v29 = vld [vmem:[%s2430_s1 + $0x20] sm:$0xff] (!%p191_p9)  ;;  %v1572_v30 = vpack.c.bf16 (!%p191_p9), %v351_v28, %v350_v27  ;;  %v303_v31 = vld [vmem:[%s2430_s1 + $0x28] sm:$0xff] (!%p191_p9)  ;;  %v321_v36 = vld [vmem:[%s2430_s1 + $0xb8] sm:$0xff] (!%p191_p9) }
  0x15   : > { %v334_v32 = vld [vmem:[%s2430_s1 + $0x120] sm:$0xff]  ;;  %v335_v33 = vld [vmem:[%s2430_s1 + $0x128] sm:$0xff]  ;;  %v1542_v34 = vpack.c.bf16 %v303_v31, %v302_v29  ;;  %v352_v37 = vld [vmem:[%s2430_s1 + $0x1b0] sm:$0xff]  ;;  %v1544_v39 = vpack.c.bf16 %v321_v36, %v320_v35  ;;  %s1936_s7 = scalar_select %p218_p10, %s1806_s22, 1 }
  0x16   : > { %1539 = vmatpush3.bf16.msra.mxu0 %v1538_v21  ;;  %v1574_v38 = vpack.c.bf16 %v335_v33, %v334_v32  ;;  %v353_v40 = vld [vmem:[%s2430_s1 + $0x1b8] sm:$0xff]  ;;  %v304_v41 = vld [vmem:[%s2430_s1 + $0x30] sm:$0xff]  ;;  %v322_v46 = vld [vmem:[%s2430_s1 + $0xc0] sm:$0xff] }
  0x17   : > { %1571 = vmatpush3.bf16.msra.mxu1 %v1570_v25  ;;  %1541 = vmatprep.subr.bf16.mxu0 %v1540_v26  ;;  %v305_v42 = vld [vmem:[%s2430_s1 + $0x38] sm:$0xff]  ;;  %v1576_v43 = vpack.c.bf16 %v353_v40, %v352_v37  ;;  %v336_v44 = vld [vmem:[%s2430_s1 + $0x130] sm:$0xff]  ;;  %v323_v47 = vld [vmem:[%s2430_s1 + $0xc8] sm:$0xff]  ;;  %s1614_s11 = smul.u32 600, %s1936_s7 }
  0x18   : > { %1573 = vmatprep.subr.bf16.mxu1 %v1572_v30  ;;  %v337_v45 = vld [vmem:[%s2430_s1 + $0x138] sm:$0xff]  ;;  %v354_v48 = vld [vmem:[%s2430_s1 + $0x1c0] sm:$0xff]  ;;  %v355_v49 = vld [vmem:[%s2430_s1 + $0x1c8] sm:$0xff]  ;;  %v1546_v50 = vpack.c.bf16 %v305_v42, %v304_v41  ;;  %v1548_v52 = vpack.c.bf16 %v323_v47, %v322_v46 }
  0x19   : > { %v1578_v51 = vpack.c.bf16 %v337_v45, %v336_v44  ;;  %v306_v53 = vld [vmem:[%s2430_s1 + $0x40] sm:$0xff]  ;;  %v307_v54 = vld [vmem:[%s2430_s1 + $0x48] sm:$0xff]  ;;  %v1580_v56 = vpack.c.bf16 %v355_v49, %v354_v48  ;;  %v324_v58 = vld [vmem:[%s2430_s1 + $0xd0] sm:$0xff]  ;;  %s1993_s15 = scalar_lea.vmem %s2429_s0, %s1614_s11  ;;  %s1281_s11 = sshll.u32 %s1806_s22, 6 }
  0x1a   : > { %1543 = vmatpush3.bf16.msra.mxu0 %v1542_v34  ;;  %v338_v55 = vld [vmem:[%s2430_s1 + $0x140] sm:$0xff]  ;;  %v339_v57 = vld [vmem:[%s2430_s1 + $0x148] sm:$0xff]  ;;  %v325_v59 = vld [vmem:[%s2430_s1 + $0xd8] sm:$0xff]  ;;  %v1550_v62 = vpack.c.bf16 %v307_v54, %v306_v53  ;;  %v1752_v53 = vmov 0.0   ;;  %s2387_s12 = scalar_lea.hbm %s2434_s5, %s1281_s11  ;;  %s1754_s22 = smov [#allocation2]  }
  0x1b   : > { %1575 = vmatpush3.bf16.msra.mxu1 %v1574_v38  ;;  %1545 = vmatprep.subr.bf16.mxu0 %v1544_v39  ;;  %v356_v60 = vld [vmem:[%s2430_s1 + $0x1d0] sm:$0xff]  ;;  %v357_v61 = vld [vmem:[%s2430_s1 + $0x1d8] sm:$0xff]  ;;  %v1582_v63 = vpack.c.bf16 %v339_v57, %v338_v55  ;;  %v1552_v0 = vpack.c.bf16 %v325_v59, %v324_v58  ;;  %v326_v6 = vld [vmem:[%s2430_s1 + $0xe0] sm:$0xff]  ;;  %v1751_v39 = vmov 0.0|0.0   ;;  %s1691_s16 = sshll.u32 %s1754_s22, 4  ;;  %s1692_s16 = int_to_ptr.vmem [resolvable:$false] %s1691_s16 }
  0x1c   : > { %1577 = vmatprep.subr.bf16.mxu1 %v1576_v43  ;;  %v308_v1 = vld [vmem:[%s2430_s1 + $0x50] sm:$0xff]  ;;  %v309_v2 = vld [vmem:[%s2430_s1 + $0x58] sm:$0xff]  ;;  %v1584_v4 = vpack.c.bf16 %v357_v61, %v356_v60  ;;  %v327_v7 = vld [vmem:[%s2430_s1 + $0xe8] sm:$0xff]  ;;  %s1693_s17 = scalar_lea.vmem %s1692_s16, 128 }
  0x1d   : > { %v340_v3 = vld [vmem:[%s2430_s1 + $0x150] sm:$0xff]  ;;  %v341_v5 = vld [vmem:[%s2430_s1 + $0x158] sm:$0xff]  ;;  %v358_v8 = vld [vmem:[%s2430_s1 + $0x1e0] sm:$0xff]  ;;  %v1554_v10 = vpack.c.bf16 %v309_v2, %v308_v1  ;;  %v1556_v14 = vpack.c.bf16 %v327_v7, %v326_v6 }
  0x1e   : > { %1547 = vmatpush3.bf16.msra.mxu0 %v1546_v50  ;;  %v359_v9 = vld [vmem:[%s2430_s1 + $0x1e8] sm:$0xff]  ;;  %v310_v11 = vld [vmem:[%s2430_s1 + $0x60] sm:$0xff]  ;;  %v1586_v13 = vpack.c.bf16 %v341_v5, %v340_v3  ;;  %v226_v17 = vld [vmem:[%s1993_s15 + $0x18] sm:$0xff] }
  0x1f   : > { %1579 = vmatpush3.bf16.msra.mxu1 %v1578_v51  ;;  %1549 = vmatprep.subr.bf16.mxu0 %v1548_v52  ;;  %v311_v12 = vld [vmem:[%s2430_s1 + $0x68] sm:$0xff]  ;;  %v342_v15 = vld [vmem:[%s2430_s1 + $0x160] sm:$0xff]  ;;  %v1588_v18 = vpack.c.bf16 %v359_v9, %v358_v8  ;;  %v328_v20 = vld [vmem:[%s2430_s1 + $0xf0] sm:$0xff] }
  0x20   : > { %1581 = vmatprep.subr.bf16.mxu1 %v1580_v56  ;;  %v224_v16 = vld [vmem:[%s1993_s15 + $0x8] sm:$0xff]  ;;  %v329_v21 = vld [vmem:[%s2430_s1 + $0xf8] sm:$0xff]  ;;  %v360_v22 = vld [vmem:[%s2430_s1 + $0x1f0] sm:$0xff]  ;;  %628 = vmatprep.mubr.f32.mxu1 %v226_v17  ;;  %v1558_v24 = vpack.c.bf16 %v311_v12, %v310_v11 }
  0x21   : > { %v343_v19 = vld [vmem:[%s2430_s1 + $0x168] sm:$0xff]  ;;  %488 = vmatprep.mubr.f32.mxu0 %v224_v16  ;;  %v361_v23 = vld [vmem:[%s2430_s1 + $0x1f8] sm:$0xff]  ;;  %v1560_v26 = vpack.c.bf16 %v329_v21, %v328_v20  ;;  %v312_v27 = vld [vmem:[%s2430_s1 + $0x70] sm:$0xff] }
  0x22   : > { %1551 = vmatpush3.bf16.msra.mxu0 %v1550_v62  ;;  %v1590_v25 = vpack.c.bf16 %v343_v19, %v342_v15  ;;  %v313_v28 = vld [vmem:[%s2430_s1 + $0x78] sm:$0xff]  ;;  %v1592_v29 = vpack.c.bf16 %v361_v23, %v360_v22  ;;  %v344_v30 = vld [vmem:[%s2430_s1 + $0x170] sm:$0xff]  ;;  %v362_v34 = vld [vmem:[%s2430_s1 + $0x200] sm:$0xff] }
  0x23   : > { %1583 = vmatpush3.bf16.msra.mxu1 %v1582_v63  ;;  %1553 = vmatprep.subr.bf16.mxu0 %v1552_v0  ;;  %v345_v31 = vld [vmem:[%s2430_s1 + $0x178] sm:$0xff]  ;;  %v1562_v32 = vpack.c.bf16 %v313_v28, %v312_v27  ;;  %v363_v35 = vld [vmem:[%s2430_s1 + $0x208] sm:$0xff]  ;;  %v223_v36 = vld [vmem:[%s1993_s15] sm:$0xff] }
  0x24   : > { %1585 = vmatprep.subr.bf16.mxu1 %v1584_v4  ;;  %v1594_v33 = vpack.c.bf16 %v345_v31, %v344_v30  ;;  %v1597_v37 = vpack.c.bf16 %v363_v35, %v362_v34  ;;  %v225_v38 = vld [vmem:[%s1993_s15 + $0x10] sm:$0xff]  ;;  %v231_v41 = vld [vmem:[%s1993_s15 + $0x40] sm:$0xff]  ;;  %v365_v43 = vld [vmem:[%s2430_s1 + $0x218] sm:$0xff] }
  0x25   : > { %v229_v40 = vld [vmem:[%s1993_s15 + $0x30] sm:$0xff]  ;;  %v228_v44 = vld [vmem:[%s1993_s15 + $0x28] sm:$0xff]  ;;  %v230_v45 = vld [vmem:[%s1993_s15 + $0x38] sm:$0xff] }
  0x26   : > { %1555 = vmatpush3.bf16.msra.mxu0 %v1554_v10  ;;  %v364_v42 = vld [vmem:[%s2430_s1 + $0x210] sm:$0xff]  ;;  %v234_v46 = vld [vmem:[%s1993_s15 + $0x58] sm:$0xff]  ;;  %v236_v48 = vld [vmem:[%s1993_s15 + $0x68] sm:$0xff] }
  0x27   : > { %1587 = vmatpush3.bf16.msra.mxu1 %v1586_v13  ;;  %1557 = vmatprep.subr.bf16.mxu0 %v1556_v14  ;;  %v1600_v47 = vpack.c.bf16 %v365_v43, %v364_v42  ;;  %v233_v49 = vld [vmem:[%s1993_s15 + $0x50] sm:$0xff]  ;;  %v235_v50 = vld [vmem:[%s1993_s15 + $0x60] sm:$0xff]  ;;  %v238_v55 = vld [vmem:[%s1993_s15 + $0x78] sm:$0xff] }
  0x28   : > { %1589 = vmatprep.subr.bf16.mxu1 %v1588_v18  ;;  %v239_v51 = vld [vmem:[%s1993_s15 + $0x80] sm:$0xff]  ;;  %v241_v52 = vld [vmem:[%s1993_s15 + $0x90] sm:$0xff]  ;;  %v240_v56 = vld [vmem:[%s1993_s15 + $0x88] sm:$0xff] }
  0x29   : > { %v366_v54 = vld [vmem:[%s2430_s1 + $0x220] sm:$0x3f]  ;;  %v244_v57 = vld [vmem:[%s1993_s15 + $0xa8] sm:$0xff]  ;;  %v246_v58 = vld [vmem:[%s1993_s15 + $0xb8] sm:$0xff] }
  0x2a   : > { %1559 = vmatpush3.bf16.msra.mxu0 %v1558_v24  ;;  %v243_v59 = vld [vmem:[%s1993_s15 + $0xa0] sm:$0xff]  ;;  %v245_v60 = vld [vmem:[%s1993_s15 + $0xb0] sm:$0xff]  ;;  %v248_v63 = vld [vmem:[%s1993_s15 + $0xc8] sm:$0xff] }
  0x2b   : > { %1591 = vmatpush3.bf16.msra.mxu1 %v1590_v25  ;;  %1561 = vmatprep.subr.bf16.mxu0 %v1560_v26  ;;  %v249_v61 = vld [vmem:[%s1993_s15 + $0xd0] sm:$0xff]  ;;  %v251_v62 = vld [vmem:[%s1993_s15 + $0xe0] sm:$0xff]  ;;  %v250_v0 = vld [vmem:[%s1993_s15 + $0xd8] sm:$0xff] }
  0x2c   : > { %1593 = vmatprep.subr.bf16.mxu1 %v1592_v29  ;;  %v254_v1 = vld [vmem:[%s1993_s15 + $0xf8] sm:$0xff]  ;;  %v256_v2 = vld [vmem:[%s1993_s15 + $0x108] sm:$0xff]  ;;  %v253_v3 = vld [vmem:[%s1993_s15 + $0xf0] sm:$0xff] }
  0x2d   : > { %v255_v4 = vld [vmem:[%s1993_s15 + $0x100] sm:$0xff]  ;;  %v261_v6 = vld [vmem:[%s1993_s15 + $0x130] sm:$0xff]  ;;  %v258_v7 = vld [vmem:[%s1993_s15 + $0x118] sm:$0xff] }
  0x2e   : > { %1563 = vmatpush3.bf16.msra.mxu0 %v1562_v32  ;;  %v259_v5 = vld [vmem:[%s1993_s15 + $0x120] sm:$0xff]  ;;  %v260_v8 = vld [vmem:[%s1993_s15 + $0x128] sm:$0xff]  ;;  %v266_v10 = vld [vmem:[%s1993_s15 + $0x158] sm:$0xff] }
  0x2f   : > { %1595 = vmatpush3.bf16.msra.mxu1 %v1594_v33  ;;  %1596 = vmatprep.subr.bf16.mxu0 %v1751_v39  ;;  %v264_v9 = vld [vmem:[%s1993_s15 + $0x148] sm:$0xff]  ;;  %v263_v11 = vld [vmem:[%s1993_s15 + $0x140] sm:$0xff]  ;;  %v265_v12 = vld [vmem:[%s1993_s15 + $0x150] sm:$0xff] }
  0x30   : > { %1608 = vmatprep.subr.bf16.mxu1 %v1751_v39  ;;  %v269_v13 = vld [vmem:[%s1993_s15 + $0x170] sm:$0xff]  ;;  %v271_v14 = vld [vmem:[%s1993_s15 + $0x180] sm:$0xff]  ;;  %v268_v15 = vld [vmem:[%s1993_s15 + $0x168] sm:$0xff] }
  0x31   : > { %489 = vmatmul.mubr.f32.vlgmr.msra.gmra.mrb[0].mxu0 %v223_v36  ;;  %v270_v16 = vld [vmem:[%s1993_s15 + $0x178] sm:$0xff]  ;;  %v276_v18 = vld [vmem:[%s1993_s15 + $0x1a8] sm:$0xff]  ;;  %v273_v19 = vld [vmem:[%s1993_s15 + $0x190] sm:$0xff] }
  0x32   : > { %629 = vmatmul.mubr.f32.vlgmr.msra.gmra.mrb[0].mxu1 %v225_v38  ;;  %1598 = vmatpush3.bf16.msra.mxu0 %v1597_v37  ;;  %v274_v17 = vld [vmem:[%s1993_s15 + $0x198] sm:$0xff]  ;;  %v275_v20 = vld [vmem:[%s1993_s15 + $0x1a0] sm:$0xff]  ;;  %v281_v22 = vld [vmem:[%s1993_s15 + $0x1d0] sm:$0xff] }
  0x33   : > { %493 = vmatprep.mubr.f32.mxu0 %v229_v40  ;;  %633 = vmatprep.mubr.f32.mxu1 %v231_v41  ;;  %v279_v21 = vld [vmem:[%s1993_s15 + $0x1c0] sm:$0xff]  ;;  %v278_v23 = vld [vmem:[%s1993_s15 + $0x1b8] sm:$0xff]  ;;  %v280_v24 = vld [vmem:[%s1993_s15 + $0x1c8] sm:$0xff] }
  0x34   : > { %1611 = vmatpush3.bf16.msra.mxu1 %v1597_v37  ;;  %1599 = vmatprep.subr.bf16.mxu0 %v1751_v39  ;;  %v284_v25 = vld [vmem:[%s1993_s15 + $0x1e8] sm:$0xff]  ;;  %v286_v26 = vld [vmem:[%s1993_s15 + $0x1f8] sm:$0xff]  ;;  %v283_v27 = vld [vmem:[%s1993_s15 + $0x1e0] sm:$0xff] }
  0x35   : > { %494 = vmatmul.mubr.f32.gmra.mrb[2].mxu0 %v228_v44  ;;  %1609 = vmatprep.subr.bf16.mxu1 %v1751_v39  ;;  %v285_v28 = vld [vmem:[%s1993_s15 + $0x1f0] sm:$0xff]  ;;  %v291_v30 = vld [vmem:[%s1993_s15 + $0x220] sm:$0xff]  ;;  %v288_v31 = vld [vmem:[%s1993_s15 + $0x208] sm:$0xff] }
  0x36   : > { %634 = vmatmul.mubr.f32.gmra.mrb[2].mxu1 %v230_v45  ;;  %498 = vmatprep.mubr.f32.mxu0 %v234_v46  ;;  %v289_v29 = vld [vmem:[%s1993_s15 + $0x210] sm:$0xff]  ;;  %v290_v32 = vld [vmem:[%s1993_s15 + $0x218] sm:$0xff]  ;;  %v296_v34 = vld [vmem:[%s1993_s15 + $0x248] sm:$0xff] }
  0x37   : > { %638 = vmatprep.mubr.f32.mxu1 %v236_v48  ;;  %1601 = vmatpush3.bf16.msra.mxu0 %v1600_v47  ;;  %v294_v33 = vld [vmem:[%s1993_s15 + $0x238] sm:$0xff]  ;;  %v293_v35 = vld [vmem:[%s1993_s15 + $0x230] sm:$0xff]  ;;  %v295_v36 = vld [vmem:[%s1993_s15 + $0x240] sm:$0xff] }
  0x38   : > { %1612 = vmatpush3.bf16.msra.mxu1 %v1600_v47  ;;  %1472 = vmatprep.subr.mxu0 %v1752_v53  ;;  %v227_v37 = vld [vmem:[%s1993_s15 + $0x20] sm:$0xff]  ;;  %v232_v40 = vld [vmem:[%s1993_s15 + $0x48] sm:$0xff]  ;;  %v237_v42 = vld [vmem:[%s1993_s15 + $0x70] sm:$0xff] }
  0x39   : > { %499 = vmatmul.mubr.f32.gmra.mrb[4].mxu0 %v233_v49  ;;  %1610 = vmatprep.subr.mxu1 %v1752_v53  ;;  %v267_v38 = vld [vmem:[%s1993_s15 + $0x160] sm:$0xff]  ;;  %v272_v41 = vld [vmem:[%s1993_s15 + $0x188] sm:$0xff]  ;;  %v277_v43 = vld [vmem:[%s1993_s15 + $0x1b0] sm:$0xff] }
  0x3a   : > { %639 = vmatmul.mubr.f32.gmra.mrb[4].mxu1 %v235_v50  ;;  %503 = vmatprep.mubr.f32.mxu0 %v239_v51  ;;  %v242_v44 = vld [vmem:[%s1993_s15 + $0x98] sm:$0xff]  ;;  %v247_v46 = vld [vmem:[%s1993_s15 + $0xc0] sm:$0xff]  ;;  %v252_v48 = vld [vmem:[%s1993_s15 + $0xe8] sm:$0xff] }
  0x3b   : > { %643 = vmatprep.mubr.f32.mxu1 %v241_v52  ;;  %1473 = vmatpush3.msk.msra.mxu0 %vm420_vm0, %v366_v54  ;;  %v282_v45 = vld [vmem:[%s1993_s15 + $0x1d8] sm:$0xff]  ;;  %v287_v47 = vld [vmem:[%s1993_s15 + $0x200] sm:$0xff]  ;;  %v292_v49 = vld [vmem:[%s1993_s15 + $0x228] sm:$0xff] }
  0x3c   : > { %1613 = vmatpush3.msk.msra.mxu1 %vm420_vm0, %v366_v54  ;;  %v257_v50 = vld [vmem:[%s1993_s15 + $0x110] sm:$0xff]  ;;  %v262_v52 = vld [vmem:[%s1993_s15 + $0x138] sm:$0xff] }
  0x3d   : > { %504 = vmatmul.mubr.f32.gmra.mrb[6].mxu0 %v238_v55  ;;  %1602 = vmatprep.subr.bf16.mxu1 %v1751_v39  ;;  %v297_v51 = vld [vmem:[%s1993_s15 + $0x250] sm:$0xff]  ;;  %v2186_v55 = vld [vmem:[%s2431_s2] ss:$0 sm:$0xff]  ;;  %s1181_s15 = sshll.u32 %s217_s8, 4  ;;  %s2389_s15 = int_to_ptr.vmem [resolvable:$true] %s1181_s15 }
  0x3e   : > { %644 = vmatmul.mubr.f32.gmra.mrb[6].mxu1 %v240_v56  ;;  %508 = vmatprep.mubr.f32.mxu0 %v244_v57  ;;  %s1687_s14 = scalar_lea.vmem %s2389_s15, 64  ;;  %p1694_p0 = scmp.lt.s32.totalorder %s2389_s15, %s1692_s16 }
  0x3f   : > { %648 = vmatprep.mubr.f32.mxu1 %v246_v58  ;;  %p1688_p11 = scmp.ne.s32.totalorder %s2389_s15, %s1687_s14  ;;  %p1695_p1 = scmp.lt.s32.totalorder %s1693_s17, %s1687_s14 }
  0x41   : > { %509 = vmatmul.mubr.f32.gmra.mrb[8].mxu0 %v243_v59  ;;  %p1689_p12 = pnand %p1688_p11, %p1823_p5  ;;  %p1696_p2 = por %p1695_p1, %p1694_p0 }
  0x42   : > { %649 = vmatmul.mubr.f32.gmra.mrb[8].mxu1 %v245_v60  ;;  %513 = vmatprep.mubr.f32.mxu0 %v249_v61 }
  0x43   : > { %653 = vmatprep.mubr.f32.mxu1 %v251_v62  ;;  %p1690_p13 = pneg %p1689_p12 }
  0x45   : > { %514 = vmatmul.mubr.f32.gmra.mrb[10].mxu0 %v248_v63  ;;  %p1697_p3 = pnand %p1696_p2, %p1690_p13 }
  0x46   : > { %654 = vmatmul.mubr.f32.gmra.mrb[10].mxu1 %v250_v0  ;;  %518 = vmatprep.mubr.f32.mxu0 %v254_v1 }
  0x47   : > { %658 = vmatprep.mubr.f32.mxu1 %v256_v2 }
  0x49   : > { %519 = vmatmul.mubr.f32.gmra.mrb[12].mxu0 %v253_v3 }
  0x4a   : > { %659 = vmatmul.mubr.f32.gmra.mrb[12].mxu1 %v255_v4  ;;  %523 = vmatprep.mubr.f32.mxu0 %v259_v5 }
  0x4b   : > { %663 = vmatprep.mubr.f32.mxu1 %v261_v6 }
  0x4d   : > { %524 = vmatmul.mubr.f32.gmra.mrb[14].mxu0 %v258_v7 }
  0x4e   : > { %664 = vmatmul.mubr.f32.gmra.mrb[14].mxu1 %v260_v8  ;;  %528 = vmatprep.mubr.f32.mxu0 %v264_v9  ;;  %v1080_v9 = vld [vmem:[%s2432_s3] sm:$0xff] }
  0x4f   : > { %668 = vmatprep.mubr.f32.mxu1 %v266_v10  ;;  %v1081_v10 = vld [vmem:[%s2432_s3 + $0x8] sm:$0xff] }
  0x51   : > { %529 = vmatmul.mubr.f32.gmra.mrb[16].mxu0 %v263_v11  ;;  %v1082_v11 = vld [vmem:[%s2432_s3 + $0x10] sm:$0xff] }
  0x52   : > { %669 = vmatmul.mubr.f32.gmra.mrb[16].mxu1 %v265_v12  ;;  %533 = vmatprep.mubr.f32.mxu0 %v269_v13 }
  0x53   : > { %673 = vmatprep.mubr.f32.mxu1 %v271_v14 }
  0x55   : > { %534 = vmatmul.mubr.f32.gmra.mrb[18].mxu0 %v268_v15  ;;  %v1603_v15 = vpack.c.bf16 %v1081_v10, %v1080_v9 }
  0x56   : > { %674 = vmatmul.mubr.f32.gmra.mrb[18].mxu1 %v270_v16  ;;  %538 = vmatprep.mubr.f32.mxu0 %v274_v17  ;;  %v1083_v16 = vld [vmem:[%s2432_s3 + $0x18] sm:$0xff] }
  0x57   : > { %678 = vmatprep.mubr.f32.mxu1 %v276_v18 }
  0x59   : > { %539 = vmatmul.mubr.f32.gmra.mrb[20].mxu0 %v273_v19 }
  0x5a   : > { %679 = vmatmul.mubr.f32.gmra.mrb[20].mxu1 %v275_v20  ;;  %543 = vmatprep.mubr.f32.mxu0 %v279_v21  ;;  %v1606_v20 = vpack.c.bf16 %v1083_v16, %v1082_v11 }
  0x5b   : > { %683 = vmatprep.mubr.f32.mxu1 %v281_v22 }
  0x5d   : > { %544 = vmatmul.mubr.f32.gmra.mrb[22].mxu0 %v278_v23 }
  0x5e   : > { %684 = vmatmul.mubr.f32.gmra.mrb[22].mxu1 %v280_v24  ;;  %548 = vmatprep.mubr.f32.mxu0 %v284_v25 }
  0x5f   : > { %688 = vmatprep.mubr.f32.mxu1 %v286_v26 }
  0x61   : > { %549 = vmatmul.mubr.f32.gmra.mrb[24].mxu0 %v283_v27 }
  0x62   : > { %689 = vmatmul.mubr.f32.gmra.mrb[24].mxu1 %v285_v28  ;;  %553 = vmatprep.mubr.f32.mxu0 %v289_v29 }
  0x63   : > { %693 = vmatprep.mubr.f32.mxu1 %v291_v30 }
  0x65   : > { %554 = vmatmul.mubr.f32.gmra.mrb[26].mxu0 %v288_v31  ;;  %v1084_v31 = vld [vmem:[%s2432_s3 + $0x20] sm:$0xff] }
  0x66   : > { %694 = vmatmul.mubr.f32.gmra.mrb[26].mxu1 %v290_v32  ;;  %558 = vmatprep.mubr.f32.mxu0 %v294_v33 }
  0x67   : > { %698 = vmatprep.mubr.f32.mxu1 %v296_v34 }
  0x69   : > { %559 = vmatmul.mubr.f32.gmra.mrb[28].mxu0 %v293_v35 }
  0x6a   : > { %699 = vmatmul.mubr.f32.gmra.mrb[28].mxu1 %v295_v36  ;;  %1474 = vmatprep.mubr.msk.f32.mxu0 %vm1753_vm1, %v1752_v53 }
  0x6b   : > { %1498 = vmatprep.mubr.msk.f32.mxu1 %vm1753_vm1, %v1752_v53 }
  0x6d   : > { %1475 = vmatmul.mubr.msk.f32.vlgmr.msra.gmra.mrb[30].mxu0 %vm374_vm2, %v227_v37 }
  0x6e   : > { %1499 = vmatmul.mubr.msk.f32.vlgmr.msra.gmra.mrb[30].mxu1 %vm374_vm2, %v267_v38  ;;  %1477 = vmatprep.mubr.msk.f32.mxu0 %vm1753_vm1, %v1752_v53 }
  0x6f   : > { %1501 = vmatprep.mubr.msk.f32.mxu1 %vm1753_vm1, %v1752_v53  ;;  %1604 = vmatpush3.bf16.msra.mxu1 %v1603_v15 }
  0x70   : > { %1605 = vmatprep.subr.bf16.mxu1 %v1751_v39 }
  0x71   : > { %1478 = vmatmul.mubr.msk.f32.gmra.mrb[32].mxu0 %vm374_vm2, %v232_v40 }
  0x72   : > { %1502 = vmatmul.mubr.msk.f32.gmra.mrb[32].mxu1 %vm374_vm2, %v272_v41  ;;  %1480 = vmatprep.mubr.msk.f32.mxu0 %vm1753_vm1, %v1752_v53 }
  0x73   : > { %1504 = vmatprep.mubr.msk.f32.mxu1 %vm1753_vm1, %v1752_v53  ;;  %1607 = vmatpush3.bf16.msra.mxu1 %v1606_v20 }
  0x74   : > { %1527 = vmatprep.subr.mxu1 %v1752_v53 }
  0x75   : > { %1481 = vmatmul.mubr.msk.f32.gmra.mrb[34].mxu0 %vm374_vm2, %v237_v42 }
  0x76   : > { %1505 = vmatmul.mubr.msk.f32.gmra.mrb[34].mxu1 %vm374_vm2, %v277_v43  ;;  %1483 = vmatprep.mubr.msk.f32.mxu0 %vm1753_vm1, %v1752_v53 }
  0x77   : > { %1507 = vmatprep.mubr.msk.f32.mxu1 %vm1753_vm1, %v1752_v53  ;;  %1528 = vmatpush3.msra.mxu1 %v1084_v31 }
  0x79   : > { %1484 = vmatmul.mubr.msk.f32.gmra.mrb[36].mxu0 %vm374_vm2, %v242_v44 }
  0x7a   : > { %1508 = vmatmul.mubr.msk.f32.gmra.mrb[36].mxu1 %vm374_vm2, %v282_v45  ;;  %1486 = vmatprep.mubr.msk.f32.mxu0 %vm1753_vm1, %v1752_v53 }
  0x7b   : > { %1510 = vmatprep.mubr.msk.f32.mxu1 %vm1753_vm1, %v1752_v53 }
  0x7d   : > { %1487 = vmatmul.mubr.msk.f32.gmra.mrb[38].mxu0 %vm374_vm2, %v247_v46 }
  0x7e   : > { %1511 = vmatmul.mubr.msk.f32.gmra.mrb[38].mxu1 %vm374_vm2, %v287_v47  ;;  %1489 = vmatprep.mubr.msk.f32.mxu0 %vm1753_vm1, %v1752_v53 }
  0x7f   : > { %1513 = vmatprep.mubr.msk.f32.mxu1 %vm1753_vm1, %v1752_v53 }
  0x81   : > { %1490 = vmatmul.mubr.msk.f32.gmra.mrb[40].mxu0 %vm374_vm2, %v252_v48 }
  0x82   : > { %1514 = vmatmul.mubr.msk.f32.gmra.mrb[40].mxu1 %vm374_vm2, %v292_v49  ;;  %1492 = vmatprep.mubr.msk.f32.mxu0 %vm1753_vm1, %v1752_v53 }
  0x83   : > { %1516 = vmatprep.mubr.msk.f32.mxu1 %vm1753_vm1, %v1752_v53 }
  0x85   : > { %1493 = vmatmul.mubr.msk.f32.gmra.mrb[42].mxu0 %vm374_vm2, %v257_v50 }
  0x86   : > { %1517 = vmatmul.mubr.msk.f32.gmra.mrb[42].mxu1 %vm374_vm2, %v297_v51  ;;  %1495 = vmatprep.mubr.msk.f32.mxu0 %vm1753_vm1, %v1752_v53 }
  0x87   : > { %1529 = vmatprep.mubr.msk.f32.mxu1 %vm1753_vm1, %v1752_v53 }
  0x89   : > { %1496 = vmatmul.mubr.msk.f32.gmra.mrb[44].mxu0 %vm374_vm2, %v262_v52 }
 0x104   : > { %v1316_v54 = vpop.f32.mrb[0].mxu0 }
 0x105   : > { %v1317_v56 = vpop.f32.mrb[1].mxu0  ;;  %v1393_v57 = vpop.f32.mrb[0].mxu1 }
 0x106   : > { %v1318_v58 = vadd.f32 %v1317_v56, %v1316_v54  ;;  %v1394_v59 = vpop.f32.mrb[1].mxu1 }
 0x107   : > { %v1395_v60 = vadd.f32 %v1394_v59, %v1393_v57 }
 0x108   : > { %v491_v61 = vadd.f32 %v1318_v58, %v2186_v55  ;;  %v1319_v62 = vpop.f32.mrb[2].mxu0 }
 0x109   : > { %v1320_v63 = vpop.f32.mrb[3].mxu0  ;;  %v1396_v0 = vpop.f32.mrb[2].mxu1 }
 0x10a   : > { %v1321_v1 = vadd.f32 %v1320_v63, %v1319_v62  ;;  %v1397_v2 = vpop.f32.mrb[3].mxu1  ;;  %v2189_v3 = vadd.f32 %v1395_v60, %v491_v61 }
 0x10b   : > { %v1398_v4 = vadd.f32 %v1397_v2, %v1396_v0 }
 0x10c   : > { %v496_v5 = vadd.f32 %v1321_v1, %v2186_v55  ;;  %v1322_v6 = vpop.f32.mrb[4].mxu0 }
 0x10d   : > { %v1323_v7 = vpop.f32.mrb[5].mxu0  ;;  %v1399_v8 = vpop.f32.mrb[4].mxu1 }
 0x10e   : > { %v1324_v12 = vadd.f32 %v1323_v7, %v1322_v6  ;;  %v1400_v13 = vpop.f32.mrb[5].mxu1  ;;  %v2201_v14 = vadd.f32 %v1398_v4, %v496_v5 }
 0x10f   : > { %v1401_v17 = vadd.f32 %v1400_v13, %v1399_v8 }
 0x110   : > { %v501_v18 = vadd.f32 %v1324_v12, %v2186_v55  ;;  %v1325_v19 = vpop.f32.mrb[6].mxu0 }
 0x111   : > { %v1326_v21 = vpop.f32.mrb[7].mxu0  ;;  %v1402_v22 = vpop.f32.mrb[6].mxu1 }
 0x112   : > { %v1327_v23 = vadd.f32 %v1326_v21, %v1325_v19  ;;  %v1403_v24 = vpop.f32.mrb[7].mxu1  ;;  %v2208_v25 = vadd.f32 %v1401_v17, %v501_v18 }
 0x113   : > { %v1404_v26 = vadd.f32 %v1403_v24, %v1402_v22 }
 0x114   : > { %v506_v27 = vadd.f32 %v1327_v23, %v2186_v55  ;;  %v1328_v28 = vpop.f32.mrb[8].mxu0 }
 0x115   : > { %v1329_v29 = vpop.f32.mrb[9].mxu0  ;;  %v1405_v30 = vpop.f32.mrb[8].mxu1 }
 0x116   : > { %v1330_v32 = vadd.f32 %v1329_v29, %v1328_v28  ;;  %v1406_v33 = vpop.f32.mrb[9].mxu1  ;;  %v2215_v39 = vadd.f32 %v1404_v26, %v506_v27 }
 0x117   : > { %v1407_v34 = vadd.f32 %v1406_v33, %v1405_v30 }
 0x118   : > { %v511_v35 = vadd.f32 %v1330_v32, %v2186_v55  ;;  %v1331_v36 = vpop.f32.mrb[10].mxu0 }
 0x119   : > { %v1332_v37 = vpop.f32.mrb[11].mxu0  ;;  %v1408_v38 = vpop.f32.mrb[10].mxu1 }
 0x11a   : > { %v1333_v40 = vadd.f32 %v1332_v37, %v1331_v36  ;;  %v1409_v41 = vpop.f32.mrb[11].mxu1  ;;  %v2218_v42 = vadd.f32 %v1407_v34, %v511_v35 }
 0x11b   : > { %v1410_v53 = vadd.f32 %v1409_v41, %v1408_v38 }
 0x11c   : > { %v516_v43 = vadd.f32 %v1333_v40, %v2186_v55  ;;  %v1334_v44 = vpop.f32.mrb[12].mxu0 }
 0x11d   : > { %v1335_v45 = vpop.f32.mrb[13].mxu0  ;;  %v1411_v46 = vpop.f32.mrb[12].mxu1 }
 0x11e   : > { %v1336_v47 = vadd.f32 %v1335_v45, %v1334_v44  ;;  %v1412_v48 = vpop.f32.mrb[13].mxu1  ;;  %v2221_v49 = vadd.f32 %v1410_v53, %v516_v43 }
 0x11f   : > { %v1413_v50 = vadd.f32 %v1412_v48, %v1411_v46 }
 0x120   : > { %v521_v51 = vadd.f32 %v1336_v47, %v2186_v55  ;;  %v1337_v52 = vpop.f32.mrb[14].mxu0 }
 0x121   : > { %v1338_v54 = vpop.f32.mrb[15].mxu0  ;;  %v1414_v56 = vpop.f32.mrb[14].mxu1 }
 0x122   : > { %v1339_v57 = vadd.f32 %v1338_v54, %v1337_v52  ;;  %v1415_v58 = vpop.f32.mrb[15].mxu1  ;;  %v2224_v59 = vadd.f32 %v1413_v50, %v521_v51 }
 0x123   : > { %v1416_v60 = vadd.f32 %v1415_v58, %v1414_v56 }
 0x124   : > { %v526_v61 = vadd.f32 %v1339_v57, %v2186_v55  ;;  %v1340_v62 = vpop.f32.mrb[16].mxu0 }
 0x125   : > { %v1341_v63 = vpop.f32.mrb[17].mxu0  ;;  %v1417_v0 = vpop.f32.mrb[16].mxu1 }
 0x126   : > { %v1342_v1 = vadd.f32 %v1341_v63, %v1340_v62  ;;  %v1418_v2 = vpop.f32.mrb[17].mxu1  ;;  %v2227_v4 = vadd.f32 %v1416_v60, %v526_v61 }
 0x127   : > { %v1419_v5 = vadd.f32 %v1418_v2, %v1417_v0 }
 0x128   : > { %v531_v6 = vadd.f32 %v1342_v1, %v2186_v55  ;;  %v1343_v7 = vpop.f32.mrb[18].mxu0 }
 0x129   : > { %v1344_v8 = vpop.f32.mrb[19].mxu0  ;;  %v1420_v9 = vpop.f32.mrb[18].mxu1 }
 0x12a   : > { %v1345_v10 = vadd.f32 %v1344_v8, %v1343_v7  ;;  %v1421_v11 = vpop.f32.mrb[19].mxu1  ;;  %v671_v12 = vadd.f32 %v1419_v5, %v531_v6 }
 0x12b   : > { %v1422_v13 = vadd.f32 %v1421_v11, %v1420_v9 }
 0x12c   : > { %v536_v15 = vadd.f32 %v1345_v10, %v2186_v55  ;;  %v1346_v16 = vpop.f32.mrb[20].mxu0 }
 0x12d   : > { %v1347_v17 = vpop.f32.mrb[21].mxu0  ;;  %v1423_v18 = vpop.f32.mrb[20].mxu1 }
 0x12e   : > { %v1348_v19 = vadd.f32 %v1347_v17, %v1346_v16  ;;  %v1424_v20 = vpop.f32.mrb[21].mxu1  ;;  %v676_v21 = vadd.f32 %v1422_v13, %v536_v15 }
 0x12f   : > { %v1425_v22 = vadd.f32 %v1424_v20, %v1423_v18 }
 0x130   : > { %v541_v23 = vadd.f32 %v1348_v19, %v2186_v55  ;;  %v1349_v24 = vpop.f32.mrb[22].mxu0 }
 0x131   : > { %v1350_v26 = vpop.f32.mrb[23].mxu0  ;;  %v1426_v27 = vpop.f32.mrb[22].mxu1 }
 0x132   : > { %v1351_v28 = vadd.f32 %v1350_v26, %v1349_v24  ;;  %v1427_v29 = vpop.f32.mrb[23].mxu1  ;;  %v681_v30 = vadd.f32 %v1425_v22, %v541_v23 }
 0x133   : > { %v1428_v31 = vadd.f32 %v1427_v29, %v1426_v27 }
 0x134   : > { %v546_v32 = vadd.f32 %v1351_v28, %v2186_v55  ;;  %v1352_v33 = vpop.f32.mrb[24].mxu0 }
 0x135   : > { %v1353_v34 = vpop.f32.mrb[25].mxu0  ;;  %v1429_v35 = vpop.f32.mrb[24].mxu1 }
 0x136   : > { %v1354_v36 = vadd.f32 %v1353_v34, %v1352_v33  ;;  %v1430_v37 = vpop.f32.mrb[25].mxu1  ;;  %v686_v38 = vadd.f32 %v1428_v31, %v546_v32 }
 0x137   : > { %v1431_v40 = vadd.f32 %v1430_v37, %v1429_v35 }
 0x138   : > { %v551_v41 = vadd.f32 %v1354_v36, %v2186_v55  ;;  %v1355_v53 = vpop.f32.mrb[26].mxu0 }
 0x139   : > { %v1356_v43 = vpop.f32.mrb[27].mxu0  ;;  %v1432_v44 = vpop.f32.mrb[26].mxu1 }
 0x13a   : > { %v1357_v45 = vadd.f32 %v1356_v43, %v1355_v53  ;;  %v1433_v46 = vpop.f32.mrb[27].mxu1  ;;  %v2234_v47 = vadd.f32 %v1431_v40, %v551_v41 }
 0x13b   : > { %v1434_v48 = vadd.f32 %v1433_v46, %v1432_v44 }
 0x13c   : > { %v556_v50 = vadd.f32 %v1357_v45, %v2186_v55  ;;  %v1358_v51 = vpop.f32.mrb[28].mxu0 }
 0x13d   : > { %v1359_v52 = vpop.f32.mrb[29].mxu0  ;;  %v1435_v54 = vpop.f32.mrb[28].mxu1 }
 0x13e   : > { %v1360_v56 = vadd.f32 %v1359_v52, %v1358_v51  ;;  %v1436_v57 = vpop.f32.mrb[29].mxu1  ;;  %v2237_v58 = vadd.f32 %v1434_v48, %v556_v50 }
 0x13f   : > { %v1437_v60 = vadd.f32 %v1436_v57, %v1435_v54 }
 0x140   : > { %v561_v61 = vadd.f32 %v1360_v56, %v2186_v55  ;;  %v770_v62 = vpop.f32.mrb[30].mxu0 }
 0x141   : > { %v771_v63 = vadd.f32 %v770_v62, %v2189_v3  ;;  %v810_v0 = vpop.f32.mrb[30].mxu1  ;;  %v1476_v1 = vpop.f32.mrb[31].mxu0 }
 0x142   : > { %v2241_v2 = vadd.f32 %v810_v0, %v671_v12  ;;  %v1500_v5 = vpop.f32.mrb[31].mxu1  ;;  %v2243_v6 = vadd.f32 %v1437_v60, %v561_v61 }
 0x143   : > { %v859_v7 = vmul.f32 1.442695, %v771_v63  ;;  %vm844_vm7 = vcmp.gt.f32.partialorder %v771_v63, 0.0 }
 0x144   : > { %v875_v8 = vmul.f32 1.442695, %v2241_v2  ;;  %v775_v9 = vpop.f32.mrb[32].mxu0  ;;  %vm852_vm8 = vcmp.gt.f32.partialorder %v2241_v2, 0.0 }
 0x145   : > { %1657 = vpow2.f32 %v859_v7  ;;  %v2247_v10 = vadd.f32 %v775_v9, %v2201_v14  ;;  %v815_v11 = vpop.f32.mrb[32].mxu1  ;;  %v1479_v55 = vpop.f32.mrb[33].mxu0 }
 0x146   : > { %1659 = vpow2.f32 %v875_v8  ;;  %v2249_v13 = vadd.f32 %v815_v11, %v676_v21  ;;  %v1503_v3 = vpop.f32.mrb[33].mxu1 }
 0x147   : > { %v861_v12 = vmul.f32 1.442695, %v2247_v10  ;;  %vm845_vm9 = vcmp.gt.f32.partialorder %v2247_v10, 0.0 }
 0x148   : > { %v877_v15 = vmul.f32 1.442695, %v2249_v13  ;;  %v780_v16 = vpop.f32.mrb[34].mxu0  ;;  %vm853_vm11 = vcmp.gt.f32.partialorder %v2249_v13, 0.0 }
 0x149   : > { %1661 = vpow2.f32 %v861_v12  ;;  %v2254_v17 = vadd.f32 %v780_v16, %v2208_v25  ;;  %v820_v18 = vpop.f32.mrb[34].mxu1  ;;  %v1482_v19 = vpop.f32.mrb[35].mxu0 }
 0x14a   : > { %1663 = vpow2.f32 %v877_v15  ;;  %v2256_v14 = vadd.f32 %v820_v18, %v681_v30  ;;  %v1506_v20 = vpop.f32.mrb[35].mxu1 }
 0x14b   : > { %v863_v22 = vmul.f32 1.442695, %v2254_v17  ;;  %vm846_vm12 = vcmp.gt.f32.partialorder %v2254_v17, 0.0 }
 0x14c   : > { %v879_v21 = vmul.f32 1.442695, %v2256_v14  ;;  %v785_v23 = vpop.f32.mrb[36].mxu0  ;;  %vm854_vm13 = vcmp.gt.f32.partialorder %v2256_v14, 0.0 }
 0x14d   : > { %1665 = vpow2.f32 %v863_v22  ;;  %v2261_v24 = vadd.f32 %v785_v23, %v2215_v39  ;;  %v825_v26 = vpop.f32.mrb[36].mxu1  ;;  %v1485_v27 = vpop.f32.mrb[37].mxu0 }
 0x14e   : > { %1667 = vpow2.f32 %v879_v21  ;;  %v2263_v25 = vadd.f32 %v825_v26, %v686_v38  ;;  %v1509_v28 = vpop.f32.mrb[37].mxu1 }
 0x14f   : > { %v1658_v29 = vpop.eup %1657  ;;  %v865_v30 = vmul.f32 1.442695, %v2261_v24  ;;  %vm847_vm15 = vcmp.gt.f32.partialorder %v2261_v24, 0.0 }
 0x150   : > { %v1660_v31 = vpop.eup %1659  ;;  %v1263_v32 = vadd.f32 -1.0, %v1658_v29  ;;  %v881_v33 = vmul.f32 1.442695, %v2263_v25  ;;  %v790_v34 = vpop.f32.mrb[38].mxu0  ;;  %vm855_vm1 = vcmp.gt.f32.partialorder %v2263_v25, 0.0 }
 0x151   : > { %v1271_v35 = vadd.f32 -1.0, %v1660_v31  ;;  %1669 = vpow2.f32 %v865_v30  ;;  %v2268_v39 = vadd.f32 %v790_v34, %v2218_v42  ;;  %v830_v36 = vpop.f32.mrb[38].mxu1  ;;  %v1488_v37 = vpop.f32.mrb[39].mxu0 }
 0x152   : > { %1671 = vpow2.f32 %v881_v33  ;;  %v2271_v38 = vadd.f32 %v830_v36, %v2234_v47  ;;  %v1512_v40 = vpop.f32.mrb[39].mxu1  ;;  %v904_v43 = vsel %vm844_vm7, %v771_v63, %v1263_v32 }
 0x153   : > { %v1662_v41 = vpop.eup %1661  ;;  %v867_v53 = vmul.f32 1.442695, %v2268_v39  ;;  %v2279_v47 = vsel %vm852_vm8, %v2241_v2, %v1271_v35  ;;  %v920_v61 = vsel %vm919_vm3, %v904_v43, 0.0  ;;  %vm848_vm2 = vcmp.gt.f32.partialorder %v2268_v39, 0.0 }
 0x154   : > { %v1664_v42 = vpop.eup %1663  ;;  %v1264_v44 = vadd.f32 -1.0, %v1662_v41  ;;  %v883_v45 = vmul.f32 1.442695, %v2271_v38  ;;  %v795_v46 = vpop.f32.mrb[40].mxu0  ;;  %v992_v0 = vrot.slane %v2279_v47, 4  ;;  %vm856_vm7 = vcmp.gt.f32.partialorder %v2271_v38, 0.0 }
 0x155   : > { %v1272_v48 = vadd.f32 -1.0, %v1664_v42  ;;  %1673 = vpow2.f32 %v867_v53  ;;  %v2282_v50 = vadd.f32 %v795_v46, %v2221_v49  ;;  %v835_v51 = vpop.f32.mrb[40].mxu1  ;;  %v1491_v52 = vpop.f32.mrb[41].mxu0 }
 0x156   : > { %v905_v54 = vsel %vm845_vm9, %v2247_v10, %v1264_v44  ;;  %1675 = vpow2.f32 %v883_v45  ;;  %v2287_v56 = vadd.f32 %v835_v51, %v2237_v58  ;;  %v1515_v57 = vpop.f32.mrb[41].mxu1 }
 0x157   : > { %v1666_v60 = vpop.eup %1665  ;;  %v922_v62 = vsel %vm921_vm4, %v905_v54, 0.0  ;;  %v913_v49 = vsel %vm853_vm11, %v2249_v13, %v1272_v48  ;;  %v934_v7 = vrot.slane %v905_v54, 7  ;;  %v869_v9 = vmul.f32 1.442695, %v2282_v50 }
 0x158   : > { %v1668_v63 = vpop.eup %1667  ;;  %v923_v1 = vadd.f32 %v922_v62, %v920_v61  ;;  %v994_v2 = vrot.slane %v913_v49, 4  ;;  %v1265_v5 = vadd.f32 -1.0, %v1666_v60  ;;  %v800_v58 = vpop.f32.mrb[42].mxu0  ;;  %v885_v10 = vmul.f32 1.442695, %v2287_v56 }
 0x159   : > { %v1273_v8 = vadd.f32 -1.0, %v1668_v63  ;;  %v2307_v3 = vadd.f32 %v800_v58, %v2224_v59  ;;  %v840_v12 = vpop.f32.mrb[42].mxu1  ;;  %v1494_v15 = vpop.f32.mrb[43].mxu0  ;;  %v1010_v18 = vrot.slane %v913_v49, 3  ;;  %1677 = vpow2.f32 %v869_v9 }
 0x15a   : > { %v924_v11 = vrot.slane %v923_v1, 4  ;;  %v2301_v55 = vsel %vm990_vm5, %v992_v0, %v994_v2  ;;  %v906_v13 = vsel %vm846_vm12, %v2254_v17, %v1265_v5  ;;  %v1518_v22 = vpop.f32.mrb[43].mxu1  ;;  %1679 = vpow2.f32 %v885_v10 }
 0x15b   : > { %v1670_v16 = vpop.eup %1669  ;;  %v935_v19 = vrot.slane %v906_v13, 7  ;;  %v914_v20 = vsel %vm854_vm13, %v2256_v14, %v1273_v8  ;;  %v871_v29 = vmul.f32 1.442695, %v2307_v3  ;;  %v2325_v43 = vadd.f32 %v840_v12, %v2243_v6 }
 0x15c   : > { %v1672_v21 = vpop.eup %1671  ;;  %v925_v23 = vadd.f32 %v924_v11, %v923_v1  ;;  %v1011_v26 = vrot.slane %v914_v20, 3  ;;  %v1266_v27 = vadd.f32 -1.0, %v1670_v16  ;;  %v805_v17 = vpop.f32.mrb[44].mxu0  ;;  %vm849_vm8 = vcmp.gt.f32.partialorder %v2282_v50, 0.0 }
 0x15d   : > { %v936_v59 = vsel %vm933_vm6, %v934_v7, %v935_v19  ;;  %v1274_v28 = vadd.f32 -1.0, %v1672_v21  ;;  %v1497_v30 = vpop.f32.mrb[45].mxu0  ;;  %1681 = vpow2.f32 %v871_v29  ;;  %v887_v63 = vmul.f32 1.442695, %v2325_v43 }
 0x15e   : > { %v1012_v31 = vsel %vm1009_vm10, %v1010_v18, %v1011_v26  ;;  %v907_v14 = vsel %vm847_vm15, %v2261_v24, %v1266_v27  ;;  %v926_v33 = vrot.slane %v925_v23, 2  ;;  %v941_v37 = vsel %vm919_vm3, %v936_v59, 0.0 }
 0x15f   : > { %v1674_v32 = vpop.eup %1673  ;;  %v937_v34 = vrot.slane %v907_v14, 7  ;;  %v915_v35 = vsel %vm855_vm1, %v2263_v25, %v1274_v28  ;;  %v1017_v40 = vsel %vm919_vm3, %v1012_v31, 0.0  ;;  %v953_v45 = vrot.slane %v907_v14, 6 }
 0x160   : > { %v1676_v36 = vpop.eup %1675  ;;  %v1013_v41 = vrot.slane %v915_v35, 3  ;;  %v1267_v53 = vadd.f32 -1.0, %v1674_v32  ;;  %v1028_v6 = vrot.slane %v915_v35, 2  ;;  %v927_v2 = vadd.f32 %v926_v33, %v925_v23 }
 0x161   : > { %v938_v24 = vsel %vm933_vm6, %v935_v19, %v937_v34  ;;  %v1275_v42 = vadd.f32 -1.0, %v1676_v36  ;;  %1683 = vpow2.f32 %v887_v63  ;;  %vm857_vm9 = vcmp.gt.f32.partialorder %v2287_v56, 0.0 }
 0x162   : > { %v942_v44 = vsel %vm921_vm4, %v938_v24, 0.0  ;;  %v1014_v25 = vsel %vm1009_vm10, %v1011_v26, %v1013_v41  ;;  %v908_v46 = vsel %vm848_vm2, %v2268_v39, %v1267_v53  ;;  %v806_v39 = vadd.f32 %v805_v17, %v2227_v4 }
 0x163   : > { %v943_v48 = vadd.f32 %v942_v44, %v941_v37  ;;  %v1018_v51 = vsel %vm921_vm4, %v1014_v25, 0.0  ;;  %v954_v52 = vrot.slane %v908_v46, 6  ;;  %v916_v54 = vsel %vm856_vm7, %v2271_v38, %v1275_v42  ;;  %v1678_v61 = vpop.eup %1677 }
 0x164   : > { %v2336_v57 = vadd.f32 %v1018_v51, %v1017_v40  ;;  %v1029_v60 = vrot.slane %v916_v54, 2  ;;  %v1680_v1 = vpop.eup %1679  ;;  %v1268_v58 = vadd.f32 -1.0, %v1678_v61  ;;  %v873_v9 = vmul.f32 1.442695, %v806_v39 }
 0x165   : > { %v944_v62 = vrot.slane %v943_v48, 4  ;;  %v955_v49 = vsel %vm952_vm14, %v953_v45, %v954_v52  ;;  %v1276_v38 = vadd.f32 -1.0, %v1680_v1  ;;  %v928_v4 = vrot.slane %v927_v2, 1 }
 0x166   : > { %v1030_v5 = vsel %vm420_vm0, %v1028_v6, %v1029_v60  ;;  %v909_v8 = vsel %vm849_vm8, %v2282_v50, %v1268_v58  ;;  %1685 = vpow2.f32 %v873_v9  ;;  %vm850_vm11 = vcmp.gt.f32.partialorder %v2307_v3, 0.0 }
 0x167   : > { %v945_v7 = vadd.f32 %v944_v62, %v943_v48  ;;  %v956_v11 = vrot.slane %v909_v8, 6  ;;  %v917_v13 = vsel %vm857_vm9, %v2287_v56, %v1276_v38  ;;  %v1682_v15 = vpop.eup %1681  ;;  %v960_v19 = vsel %vm919_vm3, %v955_v49, 0.0 }
 0x168   : > { %v1031_v12 = vrot.slane %v917_v13, 2  ;;  %v1269_v22 = vadd.f32 -1.0, %v1682_v15  ;;  %v1035_v23 = vsel %vm919_vm3, %v1030_v5, 0.0  ;;  %v929_v27 = vadd.f32 %v928_v4, %v927_v2 }
 0x169   : > { %v946_v10 = vrot.slane %v945_v7, 2  ;;  %v957_v18 = vsel %vm952_vm14, %v954_v52, %v956_v11  ;;  %vm971_vm12 = vcmask 1042432   ;;  %v972_v30 = vrot.slane %v909_v8, 5 }
 0x16a   : > { %v961_v50 = vsel %vm921_vm4, %v957_v18, 0.0  ;;  %v1032_v20 = vsel %vm420_vm0, %v1029_v60, %v1031_v12  ;;  %v910_v59 = vsel %vm850_vm11, %v2307_v3, %v1269_v22  ;;  %vm858_vm13 = vcmp.gt.f32.partialorder %v2325_v43, 0.0 }
 0x16b   : > { %v947_v16 = vadd.f32 %v946_v10, %v945_v7  ;;  %v962_v56 = vadd.f32 %v961_v50, %v960_v19  ;;  %v1036_v26 = vsel %vm921_vm4, %v1032_v20, 0.0  ;;  %v973_v31 = vrot.slane %v910_v59, 5  ;;  %v1684_v14 = vpop.eup %1683 }
 0x16c   : > { %v1037_v17 = vadd.f32 %v1036_v26, %v1035_v23  ;;  %v1277_v35 = vadd.f32 -1.0, %v1684_v14  ;;  %v1020_v40 = vrot.slane %v2336_v57, 4  ;;  %vm1045_vm15 = vcmask 1046528  }
 0x16d   : > { %v948_v21 = vrot.slane %v947_v16, 1  ;;  %v963_v29 = vrot.slane %v962_v56, 4  ;;  %v974_v34 = vsel %vm971_vm12, %v972_v30, %v973_v31  ;;  %v1046_v53 = vrot.slane %v917_v13, 1 }
 0x16e   : > { %v918_v3 = vsel %vm858_vm13, %v2325_v43, %v1277_v35  ;;  %v1038_v44 = vrot.slane %v1037_v17, 4  ;;  %vm851_vm1 = vcmp.gt.f32.partialorder %v806_v39, 0.0  ;;  %v999_v43 = vsel %vm921_vm4, %v2301_v55, 0.0 }
 0x16f   : > { %v949_v28 = vadd.f32 %v948_v21, %v947_v16  ;;  %v964_v33 = vadd.f32 %v963_v29, %v962_v56  ;;  %v1047_v24 = vrot.slane %v918_v3, 1  ;;  %v1021_v6 = vadd.f32 %v1020_v40, %v2336_v57 }
 0x170   : > { %v1686_v37 = vpop.eup %1685  ;;  %v1039_v62 = vadd.f32 %v1038_v44, %v1037_v17  ;;  %v979_v49 = vsel %vm919_vm3, %v974_v34, 0.0 }
 0x171   : > { %v1060_v32 = vsel %vm933_vm6, %v929_v27, %v949_v28  ;;  %v965_v36 = vrot.slane %v964_v33, 2  ;;  %v1270_v42 = vadd.f32 -1.0, %v1686_v37  ;;  %v1048_v25 = vsel %vm1045_vm15, %v1046_v53, %v1047_v24 }
 0x172   : > { %v1052_v46 = vsel %vm921_vm4, %v1047_v24, 0.0  ;;  %v1051_v51 = vsel %vm919_vm3, %v1048_v25, 0.0  ;;  %v1022_v38 = vrot.slane %v1021_v6, 2  ;;  %v1040_v10 = vrot.slane %v1039_v62, 2 }
 0x173   : > { %v966_v41 = vadd.f32 %v965_v36, %v964_v33  ;;  %v911_v48 = vsel %vm851_vm1, %v806_v39, %v1270_v42  ;;  %v1053_v61 = vadd.f32 %v1052_v46, %v1051_v51 }
 0x174   : > { %v975_v52 = vrot.slane %v911_v48, 5  ;;  %v991_v54 = vrot.slane %v911_v48, 4  ;;  %v1023_v47 = vadd.f32 %v1022_v38, %v1021_v6  ;;  %v1041_v15 = vadd.f32 %v1040_v10, %v1039_v62 }
 0x175   : > { %v967_v45 = vrot.slane %v966_v41, 1  ;;  %v1054_v2 = vrot.slane %v1053_v61, 4 }
 0x176   : > { %v976_v63 = vsel %vm971_vm12, %v973_v31, %v975_v52  ;;  %v993_v39 = vsel %vm990_vm5, %v991_v54, %v992_v0  ;;  %v1024_v50 = vrot.slane %v1023_v47, 1  ;;  %v1042_v21 = vrot.slane %v1041_v15, 1 }
 0x177   : > { %v968_v60 = vadd.f32 %v967_v45, %v966_v41  ;;  %v980_v5 = vsel %vm921_vm4, %v976_v63, 0.0  ;;  %v998_v55 = vsel %vm919_vm3, %v993_v39, 0.0  ;;  %v1055_v7 = vadd.f32 %v1054_v2, %v1053_v61  ;;  %v1278_v41 = vld [vmem:[%s2433_s4] ss:$0 sm:$0xff] }
 0x178   : > { %v981_v58 = vadd.f32 %v980_v5, %v979_v49  ;;  %v1000_v57 = vadd.f32 %v999_v43, %v998_v55  ;;  %v1025_v27 = vadd.f32 %v1024_v50, %v1023_v47  ;;  %v1043_v59 = vadd.f32 %v1042_v21, %v1041_v15 }
 0x179   : > { %v1061_v1 = vsel %vm952_vm14, %v1060_v32, %v968_v60  ;;  %v1056_v11 = vrot.slane %v1055_v7, 2 }
 0x17a   : > { %v982_v8 = vrot.slane %v981_v58, 4  ;;  %v1001_v9 = vrot.slane %v1000_v57, 4 }
 0x17b   : > { %v1057_v16 = vadd.f32 %v1056_v11, %v1055_v7 }
 0x17c   : > { %v983_v13 = vadd.f32 %v982_v8, %v981_v58  ;;  %v1002_v4 = vadd.f32 %v1001_v9, %v1000_v57 }
 0x17d   : > { %v1058_v23 = vrot.slane %v1057_v16, 1 }
 0x17e   : > { %v984_v12 = vrot.slane %v983_v13, 2  ;;  %v1003_v0 = vrot.slane %v1002_v4, 2 }
 0x17f   : > { %v1059_v29 = vadd.f32 %v1058_v23, %v1057_v16 }
 0x180   : > { %v985_v18 = vadd.f32 %v984_v12, %v983_v13  ;;  %v1004_v19 = vadd.f32 %v1003_v0, %v1002_v4 }
 0x182   : > { %v986_v20 = vrot.slane %v985_v18, 1  ;;  %v1005_v22 = vrot.slane %v1004_v19, 1 }
 0x184   : > { %v987_v56 = vadd.f32 %v986_v20, %v985_v18  ;;  %v1006_v26 = vadd.f32 %v1005_v22, %v1004_v19 }
 0x186   : > { %v1062_v17 = vsel %vm971_vm12, %v1061_v1, %v987_v56 }
 0x187   : > { %v1063_v28 = vsel %vm990_vm5, %v1062_v17, %v1006_v26 }
 0x188   : > { %v1064_v30 = vsel %vm1009_vm10, %v1063_v28, %v1025_v27 }
 0x189   : > { %v1065_v31 = vsel %vm420_vm0, %v1064_v30, %v1043_v59  ;;  %vm1165_vm0 = vcmask 322560  }
 0x18a   : > { %v1066_v14 = vsel %vm1045_vm15, %v1065_v31, %v1059_v29 }
 0x18b   : > { %v1068_v32 = vrot.slane %v1066_v14, 1  ;;  %v1071_v34 = vrot.slane %v1066_v14, 2  ;;  %v1074_v36 = vrot.slane %v1066_v14, 3  ;;  %v1077_v40 = vrot.slane %v1066_v14, 4 }
 0x18d   : > { %v1070_v33 = vadd.f32 %v1068_v32, %v1066_v14 }
 0x18f   : > { %v1073_v35 = vadd.f32 %v1071_v34, %v1070_v33 }
 0x191   : > { %v1076_v37 = vadd.f32 %v1074_v36, %v1073_v35 }
 0x193   : > { %v1079_v3 = vadd.f32 %v1077_v40, %v1076_v37 }
 0x195   : > { %1530 = vmatmul.mubr.msk.f32.vlgmr.msra.gmra.mrb[44].mxu1 %vm919_vm3, %v1079_v3 }
 0x268   : > { %v1161_v53 = vpop.f32.mrb[44].mxu1 }
 0x269   : > { %v1162_v24 = vadd.f32 %v1278_v41, %v1161_v53  ;;  %v1531_v42 = vpop.f32.mrb[45].mxu1 }
 0x26b   : > { %1166 = vst.msk [vmem:[%s217_s8] sm:$0xf] %vm1165_vm0, %v1162_v24 }
 0x26c   : > { %1700 = shalt.err (!%p1697_p3)
}
 0x26d   : > { %s1701_s23 = scalar_lea.hbm %s2387_s12, 64  ;;  %s1705_s26 = scalar_lea.hbm %s2434_s5, 128 }
 0x26e   : > { %p1702_p4 = scmp.ne.s32.totalorder %s2387_s12, %s1701_s23  ;;  %p1706_p9 = scmp.lt.u32.totalorder %s2387_s12, %s2434_s5 }
 0x26f   : > { %p1707_p10 = scmp.lt.u32.totalorder %s1705_s26, %s1701_s23  ;;  %p1709_p12 = scmp.lt.u32.totalorder %s1701_s23, %s2387_s12 }
 0x270   : > { %p1703_p7 = pnand %p1702_p4, %p1823_p5 }
 0x271   : > { %p1708_p11 = por %p1707_p10, %p1706_p9 }
 0x272   : > { %p1704_p8 = pneg %p1703_p7 }
 0x273   : > { %p1710_p13 = por %p1709_p12, %p1708_p11 }
 0x275   : > { %p1711_p0 = pnand %p1710_p13, %p1704_p8 }
 0x277   : > { %1714 = shalt.err (!%p1711_p0)
}
 0x278   : > { %1615 = dma.vmem_to_hbm [thread:$0]  (%p1823_p5), %s2389_s15, 64, %s2387_s12, %s1168_s13  }
 0x279 PF: > { %p1621_p1 = scmp.ge.s32.totalorder %s1749_s21, 2  ;;  %s1193_s11 = sand.u32 1, %s1737_s18  }
 0x27a   : > { %s1194_s8 = scalar_lea.sflag [#allocation3], %s1193_s11 }
 0x27b   : > { %p1618_p2 = pnand %p1621_p1, %p1827_p6 }
 0x27d   : > { %1732 = dma.done.wait (!%p1618_p2), %s1194_s8, 64  }
 0x27e   : > { %1734 = vsyncadd (!%p1618_p2), %s1194_s8, 4294967232  ;;  %p15_p3 = scmp.ge.s32.totalorder %s1810_s24, 4   ;;  %s2437_s18 = smov %s1741_s19 }
 0x27f   : > { %s2438_s19 = smov %s1745_s20  ;;  %s2439_s20 = smov %s1821_s27 }
 0x280   : > { %s2440_s21 = smov %s1810_s24  ;;  %17 = sbr.rel (!%p15_p3) target bundleno = 3 (0x3), region = 75 }
 0x287   :  { %1199 = vsyncpa [#allocation3], 1 }
 0x288   :  { %1201 = vsyncpa [#allocation3 + $0x1], 1 }

</bundles_post_ra>
